<compile_context>
chip_gen: v7x
topology: tpu7x:2x2x1
jax: 0.10.0
libtpu: 0.0.40
codegen_flags: <defaults>
</compile_context>

<pallas_src>
import jax
import jax.numpy as jnp
from jax.experimental import pallas as pl
from jax.experimental.pallas import tpu as pltpu


# ----------------------------------------------------------------------------
# Kernels
# ----------------------------------------------------------------------------
def _make_packed_kernel(eps: float, d: int, p: int):
    """Lane-packed kernel: each 128-lane row holds p logical rows of width d."""
    inv_d = 1.0 / d
    inv_dm1 = 1.0 / max(d - 1, 1)   # d == 1 is nonsensical LayerNorm; avoid a trace-time crash

    def kernel(x_ref, alpha_ref, beta_ref, o_ref):
        x = x_ref[...].astype(jnp.float32)              # (TR, 128)
        tr = x.shape[0]

        def seg_sum_broadcast(v):
            # Segmented sum over each d-lane group, broadcast back to the
            # group's d lanes.  Exact f32 (no MXU precision involved); the
            # per-group work is d-lane wide, the only full-width op is the
            # final lane concatenation.
            parts = []
            for g in range(p):
                s = jnp.sum(v[:, g * d:(g + 1) * d], axis=-1, keepdims=True)  # (TR, 1)
                parts.append(jnp.broadcast_to(s, (tr, d)))
            return jnp.concatenate(parts, axis=-1)       # (TR, 128)

        mean = seg_sum_broadcast(x) * inv_d
        centered = x - mean
        var = seg_sum_broadcast(centered * centered) * inv_dm1   # unbiased (d-1)
        std = jnp.sqrt(var) + eps                                # eps added to STD (torch semantics)
        # EUP approx reciprocal + one Newton step -> ~f32 accuracy, no divide.
        r = pl.reciprocal(std, approx=True)
        inv_std = r * (2.0 - std * r)
        y = centered * inv_std * alpha_ref[...] + beta_ref[...]  # all at 128-lane width
        o_ref[...] = y.astype(o_ref.dtype)

    return kernel


def _make_rowwise_kernel(eps: float):
    """Generic fallback: normalized axis is the (possibly masked) lane axis."""
    def kernel(x_ref, alpha_ref, beta_ref, o_ref):
        x = x_ref[...].astype(jnp.float32)               # (TR, d)
        d = x.shape[-1]
        mean = jnp.mean(x, axis=-1, keepdims=True)
        centered = x - mean
        var = jnp.sum(centered * centered, axis=-1, keepdims=True) * (1.0 / max(d - 1, 1))
        std = jnp.sqrt(var) + eps
        r = pl.reciprocal(std, approx=True)
        inv_std = r * (2.0 - std * r)
        y = centered * inv_std * alpha_ref[...] + beta_ref[...]
        o_ref[...] = y.astype(o_ref.dtype)

    return kernel


# ----------------------------------------------------------------------------
# Tiling / VMEM heuristics
# ----------------------------------------------------------------------------
def _choose_tile_rows(rows, width, itemsize, *, target_f32_tile_bytes=4 << 20):
    """Pick a row tile ~4 MiB in f32-working-set terms.

    - sublane multiple depends on dtype packing (8 f32 / 16 bf16 / 32 int8).
    - caps at ceil(rows/2) so large problems always produce >= 2 grid blocks
      (both v7x TensorCores get work under dimension_semantics=("parallel",)).
    - tiny problems use a single full-extent block (valid even if rows % 8 != 0).
    """
    sub = {1: 32, 2: 16}.get(itemsize, 8)
    if rows <= 2 * sub:
        return rows                                  # single full-extent block
    tr = max(sub, target_f32_tile_bytes // (width * 4))
    half_rows = (rows + 1) // 2
    half_rows = ((half_rows + sub - 1) // sub) * sub  # round up to sublane multiple
    tr = min(tr, half_rows)
    tr = max(sub, (tr // sub) * sub)
    return int(tr)


def _vmem_limit_bytes(tile_rows, width, itemsize):
    """Scoped-VMEM limit from the honest footprint, leaving headroom on v7x."""
    blk_io = tile_rows * width * itemsize            # one x/out block
    blk_f32 = tile_rows * width * 4                  # one f32 intermediate
    est = 4 * blk_io + 4 * blk_f32 + (4 << 20)       # 2x in + 2x out buffers + temps + slack
    return int(min(max(est, 16 << 20), 48 << 20))    # never claim all of v7x's 64 MiB


# ----------------------------------------------------------------------------
# Wrapper
# ----------------------------------------------------------------------------
def layernorm_pallas(x, alpha, beta, eps=1e-6, *, tile_rows=None):
    """x: (..., d); alpha, beta: (d,). Normalizes over the last axis."""
    orig_shape = x.shape
    d = orig_shape[-1]
    x2 = x.reshape(-1, d)
    n = x2.shape[0]
    itemsize = jnp.dtype(x.dtype).itemsize

    # Lane-dense packing path: d divides 128 and rows pack evenly. The reshape
    # is contiguous (free). Guard d >= 8 so the unrolled per-group reduction
    # stays small.
    pack = (8 <= d < 128) and (128 % d == 0) and (n % (128 // d) == 0)
    if pack:
        p = 128 // d
        w = 128
        rows = n // p
        xk = x2.reshape(rows, w)
        alpha_k = jnp.tile(alpha.astype(jnp.float32), p).reshape(1, w)
        beta_k = jnp.tile(beta.astype(jnp.float32), p).reshape(1, w)
        kernel = _make_packed_kernel(eps, d, p)
    else:
        w = d
        rows = n
        xk = x2
        alpha_k = alpha.astype(jnp.float32).reshape(1, w)
        beta_k = beta.astype(jnp.float32).reshape(1, w)
        kernel = _make_rowwise_kernel(eps)

    if tile_rows is None:
        tile_rows = _choose_tile_rows(rows, w, itemsize)
    tile_rows = int(min(tile_rows, rows))
    n_blocks = pl.cdiv(rows, tile_rows)
    # Ragged rows: no jnp.pad — the last block overhangs; OOB rows compute
    # garbage (row-independent) and their stores are masked off by Pallas.

    out = pl.pallas_call(
        kernel,
        out_shape=jax.ShapeDtypeStruct((rows, w), x.dtype),
        grid_spec=pltpu.PrefetchScalarGridSpec(
            num_scalar_prefetch=0,
            grid=(n_blocks,),
            in_specs=[
                pl.BlockSpec((tile_rows, w), lambda i: (i, 0)),  # x row-tile
                pl.BlockSpec((1, w), lambda i: (0, 0)),          # alpha (broadcast, fetched once)
                pl.BlockSpec((1, w), lambda i: (0, 0)),          # beta  (broadcast, fetched once)
            ],
            out_specs=pl.BlockSpec((tile_rows, w), lambda i: (i, 0)),
        ),
        compiler_params=pltpu.CompilerParams(
            dimension_semantics=("parallel",),                    # row tiles shard across v7x's 2 TCs
            vmem_limit_bytes=_vmem_limit_bytes(tile_rows, w, itemsize),
        ),
    )(xk, alpha_k, beta_k)

    return out.reshape(orig_shape)


def layernorm_ref(x, alpha, beta, eps=1e-6):
    """Pure-JAX reference mirroring the PyTorch forward."""
    avg = jnp.mean(x, axis=-1, keepdims=True)
    std = jnp.std(x, axis=-1, keepdims=True, ddof=1) + eps
    return (x - avg) / std * alpha + beta


if __name__ == "__main__":
    key = jax.random.PRNGKey(0)
    kx, ka, kb, kx2, kx3 = jax.random.split(key, 5)

    # Small shapes consistent with the module: 8 "rows", hidden d=32.
    N, d = 8, 32
    x = jax.random.normal(kx, (N, d), dtype=jnp.float32)
    alpha = jax.random.normal(ka, (d,), dtype=jnp.float32)   # module does torch.randn(d)
    beta = jax.random.normal(kb, (d,), dtype=jnp.float32)

    out = jax.block_until_ready(layernorm_pallas(x, alpha, beta, eps=1e-6))
    ref = layernorm_ref(x, alpha, beta, eps=1e-6)
    assert out.shape == (N, d)
    assert jnp.allclose(out, ref, atol=1e-4, rtol=1e-4), "mismatch vs reference (packed path)"

    # Ragged row count (still lane-packed, 20 % 4 == 0) — exercises the
    # no-padding overhang handling at larger row counts in production.
    N2 = 20
    x_r = jax.random.normal(kx2, (N2, d), dtype=jnp.float32)
    out_r = jax.block_until_ready(layernorm_pallas(x_r, alpha, beta, eps=1e-6))
    ref_r = layernorm_ref(x_r, alpha, beta, eps=1e-6)
    assert out_r.shape == (N2, d)
    assert jnp.allclose(out_r, ref_r, atol=1e-4, rtol=1e-4), "mismatch vs reference (ragged N)"

    # Generic fallback path (d does not divide 128 -> masked-lane row-wise kernel).
    d3 = 33
    x_g = jax.random.normal(kx3, (N, d3), dtype=jnp.float32)
    alpha3 = jax.random.normal(ka, (d3,), dtype=jnp.float32)
    beta3 = jax.random.normal(kb, (d3,), dtype=jnp.float32)
    out_g = jax.block_until_ready(layernorm_pallas(x_g, alpha3, beta3, eps=1e-6))
    ref_g = layernorm_ref(x_g, alpha3, beta3, eps=1e-6)
    assert out_g.shape == (N, d3)
    assert jnp.allclose(out_g, ref_g, atol=1e-4, rtol=1e-4), "mismatch vs reference (generic path)"

    print("KERNEL_OK")
</pallas_src>

<mosaic_0001>
module attributes {stable_mosaic.version = 11 : i64} {
  func.func @kernel(%arg0: i32, %arg1: memref<2x128xf32, #tpu.memory_space<vmem>>, %arg2: memref<1x128xf32, #tpu.memory_space<vmem>>, %arg3: memref<1x128xf32, #tpu.memory_space<vmem>>, %arg4: memref<2x128xf32, #tpu.memory_space<vmem>>) attributes {dimension_semantics = [#tpu.dimension_semantics<parallel>], iteration_bounds = array<i64: 1>, scalar_prefetch = 0 : i64, scratch_operands = 0 : i64, tpu.core_type = #tpu.core_type<tc>, window_params = [{transform_indices = @transform_0, window_bounds = array<i64: 2, 128>}, {pipeline_mode = #tpu.pipeline_mode<synchronous>, transform_indices = @transform_1, window_bounds = array<i64: 1, 128>}, {pipeline_mode = #tpu.pipeline_mode<synchronous>, transform_indices = @transform_2, window_bounds = array<i64: 1, 128>}, {transform_indices = @transform_3, window_bounds = array<i64: 2, 128>}]} {
    %c0 = arith.constant 0 : index
    %c0_0 = arith.constant 0 : index
    %0 = vector.load %arg1[%c0, %c0_0] : memref<2x128xf32, #tpu.memory_space<vmem>>, vector<2x128xf32>
    %1 = vector.extract_strided_slice %0 {offsets = [0, 0], sizes = [2, 32], strides = [1, 1]} : vector<2x128xf32> to vector<2x32xf32>
    %cst = arith.constant dense<0.000000e+00> : vector<2xf32>
    %2 = vector.multi_reduction <add>, %1, %cst [1] : vector<2x32xf32> to vector<2xf32>
    %3 = vector.shape_cast %2 : vector<2xf32> to vector<2x1xf32>
    %4 = vector.shape_cast %3 : vector<2x1xf32> to vector<2x1xf32>
    %5 = vector.broadcast %4 : vector<2x1xf32> to vector<2x32xf32>
    %6 = vector.extract_strided_slice %0 {offsets = [0, 32], sizes = [2, 32], strides = [1, 1]} : vector<2x128xf32> to vector<2x32xf32>
    %cst_1 = arith.constant dense<0.000000e+00> : vector<2xf32>
    %7 = vector.multi_reduction <add>, %6, %cst_1 [1] : vector<2x32xf32> to vector<2xf32>
    %8 = vector.shape_cast %7 : vector<2xf32> to vector<2x1xf32>
    %9 = vector.shape_cast %8 : vector<2x1xf32> to vector<2x1xf32>
    %10 = vector.broadcast %9 : vector<2x1xf32> to vector<2x32xf32>
    %11 = vector.extract_strided_slice %0 {offsets = [0, 64], sizes = [2, 32], strides = [1, 1]} : vector<2x128xf32> to vector<2x32xf32>
    %cst_2 = arith.constant dense<0.000000e+00> : vector<2xf32>
    %12 = vector.multi_reduction <add>, %11, %cst_2 [1] : vector<2x32xf32> to vector<2xf32>
    %13 = vector.shape_cast %12 : vector<2xf32> to vector<2x1xf32>
    %14 = vector.shape_cast %13 : vector<2x1xf32> to vector<2x1xf32>
    %15 = vector.broadcast %14 : vector<2x1xf32> to vector<2x32xf32>
    %16 = vector.extract_strided_slice %0 {offsets = [0, 96], sizes = [2, 32], strides = [1, 1]} : vector<2x128xf32> to vector<2x32xf32>
    %cst_3 = arith.constant dense<0.000000e+00> : vector<2xf32>
    %17 = vector.multi_reduction <add>, %16, %cst_3 [1] : vector<2x32xf32> to vector<2xf32>
    %18 = vector.shape_cast %17 : vector<2xf32> to vector<2x1xf32>
    %19 = vector.shape_cast %18 : vector<2x1xf32> to vector<2x1xf32>
    %20 = vector.broadcast %19 : vector<2x1xf32> to vector<2x32xf32>
    %21 = tpu.concatenate %5, %10, %15, %20 in 1 : vector<2x32xf32>, vector<2x32xf32>, vector<2x32xf32>, vector<2x32xf32> -> vector<2x128xf32>
    %cst_4 = arith.constant 3.125000e-02 : f32
    %22 = vector.broadcast %cst_4 : f32 to vector<2x128xf32>
    %23 = arith.mulf %21, %22 : vector<2x128xf32>
    %24 = arith.subf %0, %23 : vector<2x128xf32>
    %25 = arith.mulf %24, %24 : vector<2x128xf32>
    %26 = vector.extract_strided_slice %25 {offsets = [0, 0], sizes = [2, 32], strides = [1, 1]} : vector<2x128xf32> to vector<2x32xf32>
    %cst_5 = arith.constant dense<0.000000e+00> : vector<2xf32>
    %27 = vector.multi_reduction <add>, %26, %cst_5 [1] : vector<2x32xf32> to vector<2xf32>
    %28 = vector.shape_cast %27 : vector<2xf32> to vector<2x1xf32>
    %29 = vector.shape_cast %28 : vector<2x1xf32> to vector<2x1xf32>
    %30 = vector.broadcast %29 : vector<2x1xf32> to vector<2x32xf32>
    %31 = vector.extract_strided_slice %25 {offsets = [0, 32], sizes = [2, 32], strides = [1, 1]} : vector<2x128xf32> to vector<2x32xf32>
    %cst_6 = arith.constant dense<0.000000e+00> : vector<2xf32>
    %32 = vector.multi_reduction <add>, %31, %cst_6 [1] : vector<2x32xf32> to vector<2xf32>
    %33 = vector.shape_cast %32 : vector<2xf32> to vector<2x1xf32>
    %34 = vector.shape_cast %33 : vector<2x1xf32> to vector<2x1xf32>
    %35 = vector.broadcast %34 : vector<2x1xf32> to vector<2x32xf32>
    %36 = vector.extract_strided_slice %25 {offsets = [0, 64], sizes = [2, 32], strides = [1, 1]} : vector<2x128xf32> to vector<2x32xf32>
    %cst_7 = arith.constant dense<0.000000e+00> : vector<2xf32>
    %37 = vector.multi_reduction <add>, %36, %cst_7 [1] : vector<2x32xf32> to vector<2xf32>
    %38 = vector.shape_cast %37 : vector<2xf32> to vector<2x1xf32>
    %39 = vector.shape_cast %38 : vector<2x1xf32> to vector<2x1xf32>
    %40 = vector.broadcast %39 : vector<2x1xf32> to vector<2x32xf32>
    %41 = vector.extract_strided_slice %25 {offsets = [0, 96], sizes = [2, 32], strides = [1, 1]} : vector<2x128xf32> to vector<2x32xf32>
    %cst_8 = arith.constant dense<0.000000e+00> : vector<2xf32>
    %42 = vector.multi_reduction <add>, %41, %cst_8 [1] : vector<2x32xf32> to vector<2xf32>
    %43 = vector.shape_cast %42 : vector<2xf32> to vector<2x1xf32>
    %44 = vector.shape_cast %43 : vector<2x1xf32> to vector<2x1xf32>
    %45 = vector.broadcast %44 : vector<2x1xf32> to vector<2x32xf32>
    %46 = tpu.concatenate %30, %35, %40, %45 in 1 : vector<2x32xf32>, vector<2x32xf32>, vector<2x32xf32>, vector<2x32xf32> -> vector<2x128xf32>
    %cst_9 = arith.constant 0.0322580636 : f32
    %47 = vector.broadcast %cst_9 : f32 to vector<2x128xf32>
    %48 = arith.mulf %46, %47 : vector<2x128xf32>
    %49 = math.sqrt %48 : vector<2x128xf32>
    %cst_10 = arith.constant 9.99999997E-7 : f32
    %50 = vector.broadcast %cst_10 : f32 to vector<2x128xf32>
    %51 = arith.addf %49, %50 : vector<2x128xf32>
    %52 = tpu.reciprocal %51 {approx = true} : vector<2x128xf32> -> vector<2x128xf32>
    %53 = arith.mulf %51, %52 : vector<2x128xf32>
    %cst_11 = arith.constant 2.000000e+00 : f32
    %54 = vector.broadcast %cst_11 : f32 to vector<2x128xf32>
    %55 = arith.subf %54, %53 : vector<2x128xf32>
    %56 = arith.mulf %52, %55 : vector<2x128xf32>
    %57 = arith.mulf %24, %56 : vector<2x128xf32>
    %c0_12 = arith.constant 0 : index
    %c0_13 = arith.constant 0 : index
    %58 = vector.load %arg2[%c0_12, %c0_13] : memref<1x128xf32, #tpu.memory_space<vmem>>, vector<1x128xf32>
    %59 = vector.broadcast %58 : vector<1x128xf32> to vector<2x128xf32>
    %60 = arith.mulf %57, %59 : vector<2x128xf32>
    %c0_14 = arith.constant 0 : index
    %c0_15 = arith.constant 0 : index
    %61 = vector.load %arg3[%c0_14, %c0_15] : memref<1x128xf32, #tpu.memory_space<vmem>>, vector<1x128xf32>
    %62 = vector.broadcast %61 : vector<1x128xf32> to vector<2x128xf32>
    %63 = arith.addf %60, %62 : vector<2x128xf32>
    %c0_16 = arith.constant 0 : index
    %c0_17 = arith.constant 0 : index
    %64 = vector.load %arg4[%c0_16, %c0_17] : memref<2x128xf32, #tpu.memory_space<vmem>>, vector<2x128xf32>
    tpu.vector_store %arg4[%c0_16, %c0_17], %63 {strides = array<i32>} : memref<2x128xf32, #tpu.memory_space<vmem>>, vector<2x128xf32>,
    return
  }
  func.func @transform_0(%arg0: i32) -> (i32, i32) {
    %c0_i32 = arith.constant 0 : i32
    %c0_i32_0 = arith.constant 0 : i32
    return %arg0, %c0_i32 : i32, i32
  }
  func.func @transform_1(%arg0: i32) -> (i32, i32) {
    %c0_i32 = arith.constant 0 : i32
    %c0_i32_0 = arith.constant 0 : i32
    %c0_i32_1 = arith.constant 0 : i32
    return %c0_i32, %c0_i32_0 : i32, i32
  }
  func.func @transform_2(%arg0: i32) -> (i32, i32) {
    %c0_i32 = arith.constant 0 : i32
    %c0_i32_0 = arith.constant 0 : i32
    %c0_i32_1 = arith.constant 0 : i32
    return %c0_i32, %c0_i32_0 : i32, i32
  }
  func.func @transform_3(%arg0: i32) -> (i32, i32) {
    %c0_i32 = arith.constant 0 : i32
    %c0_i32_0 = arith.constant 0 : i32
    return %arg0, %c0_i32 : i32, i32
  }
}

</mosaic_0001>

<bundles_post_ra>
// kernel: tpu_custom_call.1
= control target key start
LH: loop header
LB: loop body
LE: loop exit
PB: predicated region body
PF: predicated region fallthrough
CT: control target
= control target key end

     0   :  { %8 = vsyncpa [#allocation3], 0  ;;  %s263_s0 = inlined_call_operand.hbm [shape: f32[2,128], index: 0, kind: input, shape index: {}]   ;;  %s264_s1 = inlined_call_operand.vmem [shape: f32[1,128], index: 1, kind: input, shape index: {}]   ;;  %s265_s2 = inlined_call_operand.vmem [shape: f32[1,128], index: 2, kind: input, shape index: {}]   ;;  %s266_s3 = inlined_call_operand.hbm [shape: f32[2,128], index: 3, kind: output, shape index: {}]  }
   0x1   :  { %9 = vsyncpa [#allocation4], 0  ;;  %s190_s12 = smov [#allocation2]   ;;  %s142_s16 = scalar_lea.hbm %s263_s0, 32 }
   0x2   :  { %s16_s13 = sshll.u32 %s190_s12, 4  ;;  %p143_p0 = scmp.ne.s32.totalorder %s263_s0, %s142_s16  ;;  %s17_s13 = int_to_ptr.vmem [resolvable:$true] %s16_s13 }
   0x3   :  { %p146_p1 = scmp.lt.u32.totalorder %s142_s16, %s263_s0 }
   0x5   :  { %p148_p2 = pnand %p146_p1, %p143_p0 }
   0x7   :  { %151 = shalt.err (!%p148_p2)
}
   0x8   :  { %s152_s21 = scalar_lea.vmem %s17_s13, 32  ;;  %p157_p4 = scmp.lt.s32.totalorder %s17_s13, %s17_s13 }
   0x9   :  { %p153_p3 = scmp.ne.s32.totalorder %s17_s13, %s152_s21  ;;  %p158_p5 = scmp.lt.s32.totalorder %s152_s21, %s152_s21 }
   0xb   :  { %p159_p6 = por %p158_p5, %p157_p4 }
   0xd   :  { %p160_p7 = pnand %p159_p6, %p153_p3 }
   0xf   :  { %163 = shalt.err (!%p160_p7)
}
  0x10   :  { %19 = dma.hbm_to_vmem [thread:$0]  %s263_s0, 32, %s17_s13, [#allocation3]  }
  0x11   :  { %186 = dma.done.wait [#allocation3], 32  }
  0x12   :  { %187 = vsyncadd [#allocation3], 4294967264  ;;  %v27_v0 = vld [vmem:[#allocation2] sm:$0x3]  ;;  %s191_s24 = smov 96   ;;  %s192_s25 = smov 32  }
  0x13   :  { %33 = vrot.lane.b32.xlu0 %v27_v0, %s191_s24  ;;  %45 = vrot.lane.b32.xlu1 %v27_v0, %s192_s25  ;;  %s193_s26 = smov 64   ;;  %vm28_vm0 = vcmask 254976   ;;  %vm51_vm1 = vcmask 261120   ;;  %vm53_vm2 = vcmask 523264   ;;  %vm55_vm3 = vcmask 785408   ;;  %s194_s30 = smov [#allocation5]  }
  0x14   :  { %v29_v1 = vsel %vm28_vm0, %v27_v0, 0.0  ;;  %v131_v43 = vld [vmem:[%s264_s1] ss:$0 sm:$0xff]  ;;  %s122_s4 = sshll.u32 %s194_s30, 4  ;;  %s123_s4 = int_to_ptr.vmem [resolvable:$true] %s122_s4 }
  0x15   :  { %v132_v45 = vld [vmem:[%s265_s2] ss:$0 sm:$0xff]  ;;  %s164_s5 = scalar_lea.vmem %s123_s4, 32  ;;  %p169_p9 = scmp.lt.s32.totalorder %s123_s4, %s123_s4 }
  0x16   :  { %p165_p8 = scmp.ne.s32.totalorder %s123_s4, %s164_s5  ;;  %p170_p10 = scmp.lt.s32.totalorder %s164_s5, %s164_s5 }
  0x17   :  { %39 = vrot.lane.b32.xlu0 %v27_v0, %s193_s26 }
  0x18   :  { %p171_p11 = por %p170_p10, %p169_p9 }
  0x1a   :  { %p172_p12 = pnand %p171_p11, %p165_p8 }
  0x37   :  { %30 = vadd.xlane.f32.xlu1 %v29_v1 }
  0x85   :  { %v34_v2 = vpop.permute.xlu0 %33  ;;  %v46_v3 = vpop.permute.xlu1 %45 }
  0x86   :  { %v36_v4 = vsel %vm28_vm0, %v34_v2, 0.0  ;;  %v48_v5 = vsel %vm28_vm0, %v46_v3, 0.0 }
  0x87   :  { %37 = vadd.xlane.f32.xlu0 %v36_v4  ;;  %49 = vadd.xlane.f32.xlu1 %v48_v5 }
  0x89   :  { %v40_v6 = vpop.permute.xlu0 %39 }
  0x8a   :  { %v42_v7 = vsel %vm28_vm0, %v40_v6, 0.0 }
  0x8b   :  { %43 = vadd.xlane.f32.xlu0 %v42_v7 }
  0xc4   :  { %v31_v8 = vpop.xlane.xlu1 %30 }
 0x114   :  { %v38_v9 = vpop.xlane.xlu0 %37  ;;  %v50_v10 = vpop.xlane.xlu1 %49 }
 0x115   :  { %v52_v11 = vsel %vm51_vm1, %v31_v8, %v38_v9 }
 0x118   :  { %v44_v12 = vpop.xlane.xlu0 %43 }
 0x119   :  { %v54_v13 = vsel %vm53_vm2, %v52_v11, %v44_v12 }
 0x11a   :  { %v56_v14 = vsel %vm55_vm3, %v54_v13, %v50_v10 }
 0x11b   :  { %v57_v15 = vmul.f32 0.03125, %v56_v14 }
 0x11d   :  { %v58_v16 = vsub.f32 %v27_v0, %v57_v15 }
 0x11f   :  { %v59_v17 = vmul.f32 %v58_v16, %v58_v16 }
 0x121   :  { %70 = vrot.lane.b32.xlu1 %v59_v17, %s193_s26  ;;  %64 = vrot.lane.b32.xlu0 %v59_v17, %s191_s24  ;;  %v60_v18 = vsel %vm28_vm0, %v59_v17, 0.0 }
 0x125   :  { %76 = vrot.lane.b32.xlu1 %v59_v17, %s192_s25 }
 0x140   :  { %61 = vadd.xlane.f32.xlu0 %v60_v18 }
 0x193   :  { %v71_v19 = vpop.permute.xlu1 %70  ;;  %v65_v20 = vpop.permute.xlu0 %64 }
 0x194   :  { %v67_v21 = vsel %vm28_vm0, %v65_v20, 0.0  ;;  %v73_v22 = vsel %vm28_vm0, %v71_v19, 0.0 }
 0x195   :  { %68 = vadd.xlane.f32.xlu1 %v67_v21  ;;  %74 = vadd.xlane.f32.xlu0 %v73_v22 }
 0x197   :  { %v77_v23 = vpop.permute.xlu1 %76 }
 0x198   :  { %v79_v24 = vsel %vm28_vm0, %v77_v23, 0.0 }
 0x199   :  { %80 = vadd.xlane.f32.xlu0 %v79_v24 }
 0x1cd   :  { %v62_v25 = vpop.xlane.xlu0 %61 }
 0x222   :  { %v69_v26 = vpop.xlane.xlu1 %68  ;;  %v75_v27 = vpop.xlane.xlu0 %74 }
 0x223   :  { %v82_v28 = vsel %vm51_vm1, %v62_v25, %v69_v26 }
 0x224   :  { %v83_v29 = vsel %vm53_vm2, %v82_v28, %v75_v27 }
 0x226   :  { %v81_v30 = vpop.xlane.xlu0 %80 }
 0x227   :  { %v84_v31 = vsel %vm55_vm3, %v83_v29, %v81_v30 }
 0x228   :  { %v85_v32 = vmul.f32 0.032258064, %v84_v31 }
 0x22a   :  { %138 = vrsqrt.f32 %v85_v32  ;;  %vm88_vm4 = vcmp.eq.f32.partialorder %v85_v32, inf  ;;  %v91_v35 = vand.u32 2147483648, %v85_v32  ;;  %vm90_vm5 = vcmp.eq.f32.partialorder %v85_v32, 0.0 }
 0x234   :  { %v139_v33 = vpop.eup %138 }
 0x235   :  { %v87_v34 = vmul.f32 %v139_v33, %v85_v32 }
 0x237   :  { %v89_v36 = vsel %vm88_vm4, %v85_v32, %v87_v34 }
 0x238   :  { %v92_v37 = vsel %vm90_vm5, %v91_v35, %v89_v36 }
 0x239   :  { %v93_v38 = vadd.f32 1e-06, %v92_v37 }
 0x23b   :  { %140 = vrcp.f32 %v93_v38 }
 0x245   :  { %v141_v39 = vpop.eup %140 }
 0x246   :  { %v95_v40 = vmul.f32 %v141_v39, %v93_v38 }
 0x248   :  { %v96_v41 = vsub.f32 2.0, %v95_v40 }
 0x24a   :  { %v97_v42 = vmul.f32 %v141_v39, %v96_v41 }
 0x24c   :  { %v98_v44 = vmul.f32 %v97_v42, %v58_v16 }
 0x24e   :  { %v106_v46 = vmul.f32 %v131_v43, %v98_v44 }
 0x250   :  { %v114_v47 = vadd.f32 %v132_v45, %v106_v46 }
 0x252   :  { %115 = vst [vmem:[#allocation5] sm:$0x3] %v114_v47 }
 0x253   :  { %175 = shalt.err (!%p172_p12)
}
 0x254   :  { %s176_s7 = scalar_lea.hbm %s266_s3, 32 }
 0x255   :  { %p177_p13 = scmp.ne.s32.totalorder %s266_s3, %s176_s7  ;;  %p180_p0 = scmp.lt.u32.totalorder %s176_s7, %s266_s3 }
 0x257   :  { %p182_p1 = pnand %p180_p0, %p177_p13 }
 0x259   :  { %185 = shalt.err (!%p182_p1)
}
 0x25a   :  { %125 = dma.vmem_to_hbm [thread:$0]  %s123_s4, 32, %s266_s3, [#allocation4]  }
 0x25b   :  { %188 = dma.done.wait [#allocation4], 32  }
 0x25c   :  { %189 = vsyncadd [#allocation4], 4294967264 }
 0x25d   :  { %129 = vsyncpa [#allocation3], 1 }
 0x25e   :  { %130 = vsyncpa [#allocation4], 1 }

</bundles_post_ra>
